<compile_context>
chip_gen: v6e
topology: v6e:2x2x1
jax: 0.10.0
libtpu: 0.0.40
codegen_flags: <defaults>
</compile_context>

<pallas_src>
import math

import jax
import jax.numpy as jnp
from jax import lax, random
from jax.experimental import pallas as pl
from jax.experimental.pallas import tpu as pltpu


PAD_C = 128  # all channel axes padded to the 128-lane vreg width


# ----------------------------------------------------------------------------
# Pallas kernels
# ----------------------------------------------------------------------------

def matmul_bias_kernel(x_ref, w_ref, b_ref, o_ref):
    # x: (M, K), w: (K, N), b: (1, N) -> o: (M, N)
    o_ref[...] = (
        jnp.dot(x_ref[...], w_ref[...], preferred_element_type=jnp.float32)
        + b_ref[...]
    )


def fused_init_kernel(const_ref, b_ref, nw_ref, nz_ref, ys_ref, yb_ref, o_ref):
    # Initial 4x4 block head: bias + noise + lrelu + AdaIN, fused.
    # const: (1, HW, C), b/nw: (1, 1, C), nz: (N, HW, 1), ys/yb: (N, 1, C)
    v = const_ref[...] + b_ref[...] + nz_ref[...] * nw_ref[...]
    v = jnp.where(v >= 0.0, v, 0.2 * v)
    mean = jnp.mean(v, axis=1, keepdims=True)
    var = jnp.mean(jnp.square(v - mean), axis=1, keepdims=True)
    o_ref[...] = ys_ref[...] * ((v - mean) * lax.rsqrt(var + 1e-8)) + yb_ref[...]


def fused_conv_adain_kernel(xpad_ref, w_ref, cb_ref, nw_ref, nz_ref, ys_ref,
                            yb_ref, o_ref, taps_ref):
    # Equalized 3x3 SAME conv as ONE matmul with K = 9*C, fused with bias,
    # noise injection, leaky-relu(0.2) and AdaIN (instance norm + style).
    #   xpad: (N, H+2, W+2, C) zero-padded input (whole batch, VMEM resident)
    #   w:    (9*C, C)         pre-scaled conv weights, (ky,kx,Cin) flattened
    #   cb:   (1, 1, C)        conv bias
    #   nw:   (1, 1, C)        per-channel noise weight
    #   nz:   (N, HW, 1)       single-channel noise image
    #   ys/yb:(N, 1, C)        AdaIN style scale / shift
    #   o:    (N, HW, C)
    #   taps: (N*HW, 9*C)      VMEM scratch holding the in-kernel im2col
    n, hp, wp, c = xpad_ref.shape
    h, wd = hp - 2, wp - 2
    hw = h * wd

    # Build the 9 shifted taps directly from the padded VMEM tile (no HBM
    # im2col); lane offsets are 128-aligned so every store is unmasked.
    for t in range(9):
        ky, kx = divmod(t, 3)
        if wd % 8 == 0:
            tap = xpad_ref[:, ky:ky + h, kx:kx + wd, :]
            taps_ref[:, t * c:(t + 1) * c] = tap.reshape(n * hw, c)
        else:
            # tiny 4x4 resolution: per-row copies avoid an unaligned
            # sublane-collapsing reshape
            for b in range(n):
                for y in range(h):
                    taps_ref[b * hw + y * wd: b * hw + (y + 1) * wd,
                             t * c:(t + 1) * c] = xpad_ref[b, ky + y, kx:kx + wd, :]

    # Single MXU matmul, batch folded into M = N*HW, K = 9*C.
    acc = jnp.dot(taps_ref[...], w_ref[...], preferred_element_type=jnp.float32)
    acc = acc.reshape(n, hw, c)

    # bias + noise + leaky-relu epilogue
    acc = acc + cb_ref[...] + nz_ref[...] * nw_ref[...]
    acc = jnp.where(acc >= 0.0, acc, 0.2 * acc)

    # AdaIN epilogue: exact per-instance, per-channel stats over the full
    # spatial extent (whole image resident in VMEM at these sizes).
    mean = jnp.mean(acc, axis=1, keepdims=True)
    var = jnp.mean(jnp.square(acc - mean), axis=1, keepdims=True)
    normed = (acc - mean) * lax.rsqrt(var + 1e-8)
    o_ref[...] = ys_ref[...] * normed + yb_ref[...]


# ----------------------------------------------------------------------------
# Wrappers around pallas_call
# ----------------------------------------------------------------------------

def pallas_matmul_bias(x, w, b):
    m, k = x.shape
    nn = w.shape[1]
    return pl.pallas_call(
        matmul_bias_kernel,
        out_shape=jax.ShapeDtypeStruct((m, nn), jnp.float32),
        grid=(1,),
        in_specs=[
            pl.BlockSpec((m, k), lambda i: (0, 0)),
            pl.BlockSpec((k, nn), lambda i: (0, 0)),
            pl.BlockSpec((1, nn), lambda i: (0, 0)),
        ],
        out_specs=pl.BlockSpec((m, nn), lambda i: (0, 0)),
    )(x, w, b.reshape(1, nn))


def pallas_init_block(const, b, nw, nz, ys, yb):
    n = nz.shape[0]
    hw, c = const.shape[1], const.shape[2]
    return pl.pallas_call(
        fused_init_kernel,
        out_shape=jax.ShapeDtypeStruct((n, hw, c), jnp.float32),
        grid=(1,),
        in_specs=[
            pl.BlockSpec((1, hw, c), lambda i: (0, 0, 0)),
            pl.BlockSpec((1, 1, c), lambda i: (0, 0, 0)),
            pl.BlockSpec((1, 1, c), lambda i: (0, 0, 0)),
            pl.BlockSpec((n, hw, 1), lambda i: (0, 0, 0)),
            pl.BlockSpec((n, 1, c), lambda i: (0, 0, 0)),
            pl.BlockSpec((n, 1, c), lambda i: (0, 0, 0)),
        ],
        out_specs=pl.BlockSpec((n, hw, c), lambda i: (0, 0, 0)),
        compiler_params=pltpu.CompilerParams(
            dimension_semantics=("arbitrary",)),
    )(const, b, nw, nz, ys, yb)


def pallas_conv_block(xpad, w_flat, cb, nw, nz, ys, yb):
    n, hp, wp, c = xpad.shape
    h, wd = hp - 2, wp - 2
    hw = h * wd
    return pl.pallas_call(
        fused_conv_adain_kernel,
        out_shape=jax.ShapeDtypeStruct((n, hw, c), jnp.float32),
        grid=(1,),
        in_specs=[
            pl.BlockSpec((n, hp, wp, c), lambda i: (0, 0, 0, 0)),
            pl.BlockSpec((9 * c, c), lambda i: (0, 0)),
            pl.BlockSpec((1, 1, c), lambda i: (0, 0, 0)),
            pl.BlockSpec((1, 1, c), lambda i: (0, 0, 0)),
            pl.BlockSpec((n, hw, 1), lambda i: (0, 0, 0)),
            pl.BlockSpec((n, 1, c), lambda i: (0, 0, 0)),
            pl.BlockSpec((n, 1, c), lambda i: (0, 0, 0)),
        ],
        out_specs=pl.BlockSpec((n, hw, c), lambda i: (0, 0, 0)),
        scratch_shapes=[pltpu.VMEM((n * hw, 9 * c), jnp.float32)],
        compiler_params=pltpu.CompilerParams(
            dimension_semantics=("arbitrary",),
            vmem_limit_bytes=48 * 1024 * 1024),
    )(xpad, w_flat, cb, nw, nz, ys, yb)


# ----------------------------------------------------------------------------
# Parameter init (real sizes) + one-time preparation (scale-fold + pad to 128)
# ----------------------------------------------------------------------------

def init_params(key, w_dim, channels):
    keys = iter(random.split(key, 1024))

    def nrm(shape):
        return random.normal(next(keys), shape, jnp.float32)

    blocks = []
    c0 = channels[0]
    blocks.append(dict(
        const=nrm((1, 16, c0)),                    # learned 4x4 constant (flat)
        bias1=jnp.zeros((c0,), jnp.float32),
        nw1=0.1 * nrm((c0,)),
        aff1=dict(w=nrm((w_dim, 2 * c0)), b=jnp.zeros((2 * c0,), jnp.float32)),
        conv_w=nrm((3, 3, c0, c0)),
        conv_b=jnp.zeros((c0,), jnp.float32),
        nw2=0.1 * nrm((c0,)),
        aff2=dict(w=nrm((w_dim, 2 * c0)), b=jnp.zeros((2 * c0,), jnp.float32)),
    ))
    for i in range(1, len(channels)):
        cin, cout = channels[i - 1], channels[i]
        blocks.append(dict(
            conv1_w=nrm((3, 3, cin, cout)),
            conv1_b=jnp.zeros((cout,), jnp.float32),
            nw1=0.1 * nrm((cout,)),
            aff1=dict(w=nrm((w_dim, 2 * cout)), b=jnp.zeros((2 * cout,), jnp.float32)),
            conv2_w=nrm((3, 3, cout, cout)),
            conv2_b=jnp.zeros((cout,), jnp.float32),
            nw2=0.1 * nrm((cout,)),
            aff2=dict(w=nrm((w_dim, 2 * cout)), b=jnp.zeros((2 * cout,), jnp.float32)),
        ))
    to_rgb = [dict(w=nrm((c, 3)), b=jnp.zeros((3,), jnp.float32)) for c in channels]
    return dict(blocks=blocks, to_rgb=to_rgb, channels=tuple(channels), w_dim=w_dim)


def prepare_params(params):
    """Fold equalized-lr scales into weights once, pad channels to 128 lanes,
    and concatenate all AdaIN style affines into one matmul."""
    channels = params["channels"]
    w_dim = params["w_dim"]
    C = PAD_C
    nb = len(channels)
    blocks = params["blocks"]

    def conv_pack(w_real):
        kh, kw, cin, cout = w_real.shape
        scale = math.sqrt(2.0 / (cin * 9))
        wp = jnp.pad(w_real * scale, ((0, 0), (0, 0), (0, C - cin), (0, C - cout)))
        return wp.reshape(9 * C, C)

    def vec_pack(v):
        return jnp.pad(v, (0, C - v.shape[0])).reshape(1, 1, C)

    def aff_pack(aff, c_real):
        scale = math.sqrt(2.0 / w_dim)
        w = aff["w"] * scale
        b = aff["b"]
        ws, wb = w[:, :c_real], w[:, c_real:]
        bs, bb = b[:c_real], b[c_real:]
        w_pad = jnp.concatenate(
            [jnp.pad(ws, ((0, 0), (0, C - c_real))),
             jnp.pad(wb, ((0, 0), (0, C - c_real)))], axis=1)
        # fold AdaIN's "+1" on ys into the bias; padded slots stay exactly 0 so
        # padded channels remain zero through the whole network
        b_pad = jnp.concatenate(
            [jnp.pad(bs + 1.0, (0, C - c_real)),
             jnp.pad(bb, (0, C - c_real))])
        return w_pad, b_pad

    b0 = blocks[0]
    c0 = channels[0]

    convs = []
    aff_ws, aff_bs = [], []

    w1, bz1 = aff_pack(b0["aff1"], c0); aff_ws.append(w1); aff_bs.append(bz1)
    w2, bz2 = aff_pack(b0["aff2"], c0); aff_ws.append(w2); aff_bs.append(bz2)
    convs.append(dict(w=conv_pack(b0["conv_w"]), b=vec_pack(b0["conv_b"]),
                      nw=vec_pack(b0["nw2"]), upsample=False))
    for i in range(1, nb):
        blk = blocks[i]
        ci = channels[i]
        wa, ba = aff_pack(blk["aff1"], ci); aff_ws.append(wa); aff_bs.append(ba)
        wc, bc = aff_pack(blk["aff2"], ci); aff_ws.append(wc); aff_bs.append(bc)
        convs.append(dict(w=conv_pack(blk["conv1_w"]), b=vec_pack(blk["conv1_b"]),
                          nw=vec_pack(blk["nw1"]), upsample=True))
        convs.append(dict(w=conv_pack(blk["conv2_w"]), b=vec_pack(blk["conv2_b"]),
                          nw=vec_pack(blk["nw2"]), upsample=False))

    rgb = params["to_rgb"][-1]
    return dict(
        const=jnp.pad(b0["const"], ((0, 0), (0, 0), (0, C - c0))),
        init_b=vec_pack(b0["bias1"]),
        init_nw=vec_pack(b0["nw1"]),
        convs=convs,
        aff_w_all=jnp.concatenate(aff_ws, axis=1),   # (w_dim, n_aff*2*C)
        aff_b_all=jnp.concatenate(aff_bs),           # (n_aff*2*C,)
        rgb_w=rgb["w"] * math.sqrt(2.0 / channels[-1]),
        rgb_b=rgb["b"],
        c_last=channels[-1],
    )


# ----------------------------------------------------------------------------
# Pallas forward pass
# ----------------------------------------------------------------------------

def synthesis_forward(prep, w_latent, noises):
    n = w_latent.shape[0]
    C = PAD_C

    # all AdaIN style affines in ONE matmul per forward
    y_all = pallas_matmul_bias(w_latent, prep["aff_w_all"], prep["aff_b_all"])

    def style(j):
        ys = y_all[:, 2 * C * j: 2 * C * j + C].reshape(n, 1, C)
        yb = y_all[:, 2 * C * j + C: 2 * C * (j + 1)].reshape(n, 1, C)
        return ys, yb

    # initial 4x4 head: const + bias + noise + lrelu + AdaIN (one fused call)
    ys, yb = style(0)
    x = pallas_init_block(prep["const"], prep["init_b"], prep["init_nw"],
                          noises[0], ys, yb)                       # (n, 16, C)
    h = wd = 4

    for j, cv in enumerate(prep["convs"]):
        x = x.reshape(n, h, wd, C)
        if cv["upsample"]:
            x = jnp.repeat(jnp.repeat(x, 2, axis=1), 2, axis=2)    # nearest 2x (glue)
            h, wd = 2 * h, 2 * wd
        xpad = jnp.pad(x, ((0, 0), (1, 1), (1, 1), (0, 0)))
        ys, yb = style(j + 1)
        x = pallas_conv_block(xpad, cv["w"], cv["b"], cv["nw"],
                              noises[j + 1], ys, yb)               # (n, h*wd, C)

    # final equalized 1x1 conv to RGB: 3 output lanes -> plain XLA einsum
    img = jnp.einsum("nmc,co->nmo", x[:, :, :prep["c_last"]], prep["rgb_w"])
    img = img + prep["rgb_b"]
    img = img.reshape(n, h, wd, 3)
    return jnp.transpose(img, (0, 3, 1, 2))   # NCHW like PyTorch


# ----------------------------------------------------------------------------
# Pure-JAX reference (for correctness check of the Pallas kernels)
# ----------------------------------------------------------------------------

def reference_forward(params, w_latent, noises):
    channels = params["channels"]
    w_dim = params["w_dim"]
    n = w_latent.shape[0]

    def lrelu(v):
        return jnp.where(v >= 0, v, 0.2 * v)

    def adain(x4, aff):
        c = x4.shape[-1]
        y = w_latent @ (aff["w"] * math.sqrt(2.0 / w_dim)) + aff["b"]
        ys = y[:, :c] + 1.0
        yb = y[:, c:]
        mean = jnp.mean(x4, axis=(1, 2), keepdims=True)
        var = jnp.mean(jnp.square(x4 - mean), axis=(1, 2), keepdims=True)
        nm = (x4 - mean) * lax.rsqrt(var + 1e-8)
        return ys[:, None, None, :] * nm + yb[:, None, None, :]

    def conv3(x4, wt, b, nw, nz):
        nb, hh, ww, cin = x4.shape
        scale = math.sqrt(2.0 / (cin * 9))
        out = lax.conv_general_dilated(
            x4, wt * scale, (1, 1), "SAME",
            dimension_numbers=("NHWC", "HWIO", "NHWC"),
            precision=lax.Precision.HIGHEST)
        out = out + b + nz.reshape(nb, hh, ww, 1) * nw
        return lrelu(out)

    ni = iter(noises)
    b0 = params["blocks"][0]
    c0 = channels[0]
    h = wd = 4
    x = jnp.broadcast_to(b0["const"].reshape(1, 4, 4, c0), (n, 4, 4, c0))
    nz = next(ni)
    x = lrelu(x + b0["bias1"] + nz.reshape(n, h, wd, 1) * b0["nw1"])
    x = adain(x, b0["aff1"])
    x = conv3(x, b0["conv_w"], b0["conv_b"], b0["nw2"], next(ni))
    x = adain(x, b0["aff2"])
    for i in range(1, len(channels)):
        blk = params["blocks"][i]
        x = jnp.repeat(jnp.repeat(x, 2, axis=1), 2, axis=2)
        h, wd = h * 2, wd * 2
        x = conv3(x, blk["conv1_w"], blk["conv1_b"], blk["nw1"], next(ni))
        x = adain(x, blk["aff1"])
        x = conv3(x, blk["conv2_w"], blk["conv2_b"], blk["nw2"], next(ni))
        x = adain(x, blk["aff2"])
    rgb = params["to_rgb"][-1]
    img = jnp.einsum("nhwc,co->nhwo", x,
                     rgb["w"] * math.sqrt(2.0 / channels[-1])) + rgb["b"]
    return jnp.transpose(img, (0, 3, 1, 2))


# ----------------------------------------------------------------------------
# Main
# ----------------------------------------------------------------------------

if __name__ == "__main__":
    batch = 2
    w_dim = 32
    channels = (32, 32, 16, 8)   # scaled-down version of [512,...,16]

    key = jax.random.PRNGKey(0)
    k_param, k_w, k_noise = random.split(key, 3)

    params = init_params(k_param, w_dim, channels)
    prep = prepare_params(params)
    w_latent = random.normal(k_w, (batch, w_dim), jnp.float32)

    # Two noise injections per block, matching each block's spatial size.
    noises = []
    h = 4
    kn = k_noise
    for i in range(len(channels)):
        if i > 0:
            h *= 2
        for _ in range(2):
            kn, sub = random.split(kn)
            noises.append(random.normal(sub, (batch, h * h, 1), jnp.float32))

    img = synthesis_forward(prep, w_latent, noises)
    img = jax.block_until_ready(img)
    assert img.shape == (batch, 3, 32, 32), img.shape

    ref = jax.block_until_ready(reference_forward(params, w_latent, noises))
    max_err = float(jnp.max(jnp.abs(img - ref)))
    assert max_err < 1e-2, f"mismatch vs reference: max abs err = {max_err}"

    print("KERNEL_OK")
</pallas_src>

<mosaic_0001>
module attributes {stable_mosaic.version = 11 : i64} {
  func.func @matmul_bias_kernel(%arg0: i32, %arg1: memref<2x32xf32, #tpu.memory_space<vmem>>, %arg2: memref<32x2048xf32, #tpu.memory_space<vmem>>, %arg3: memref<1x2048xf32, #tpu.memory_space<vmem>>, %arg4: memref<2x2048xf32, #tpu.memory_space<vmem>>) attributes {dimension_semantics = [#tpu.dimension_semantics<arbitrary>], iteration_bounds = array<i64: 1>, scalar_prefetch = 0 : i64, scratch_operands = 0 : i64, tpu.core_type = #tpu.core_type<tc>, window_params = [{pipeline_mode = #tpu.pipeline_mode<synchronous>, transform_indices = @transform_0, window_bounds = array<i64: 2, 32>}, {pipeline_mode = #tpu.pipeline_mode<synchronous>, transform_indices = @transform_1, window_bounds = array<i64: 32, 2048>}, {pipeline_mode = #tpu.pipeline_mode<synchronous>, transform_indices = @transform_2, window_bounds = array<i64: 1, 2048>}, {pipeline_mode = #tpu.pipeline_mode<synchronous>, transform_indices = @transform_3, window_bounds = array<i64: 2, 2048>}]} {
    %c0 = arith.constant 0 : index
    %c0_0 = arith.constant 0 : index
    %0 = vector.load %arg1[%c0, %c0_0] : memref<2x32xf32, #tpu.memory_space<vmem>>, vector<2x32xf32>
    %c0_1 = arith.constant 0 : index
    %c0_2 = arith.constant 0 : index
    %1 = vector.load %arg2[%c0_1, %c0_2] : memref<32x2048xf32, #tpu.memory_space<vmem>>, vector<32x2048xf32>
    %cst = arith.constant dense<0.000000e+00> : vector<2x2048xf32>
    %2 = tpu.matmul %0, %1, %cst {dimension_numbers = #tpu.dot_dimension_numbers<[1], [0], [0], [1], [0, 0, 1, 1], [], []>} : vector<2x32xf32>, vector<32x2048xf32>, vector<2x2048xf32> -> vector<2x2048xf32>
    %c0_3 = arith.constant 0 : index
    %c0_4 = arith.constant 0 : index
    %3 = vector.load %arg3[%c0_3, %c0_4] : memref<1x2048xf32, #tpu.memory_space<vmem>>, vector<1x2048xf32>
    %4 = vector.broadcast %3 : vector<1x2048xf32> to vector<2x2048xf32>
    %5 = arith.addf %2, %4 : vector<2x2048xf32>
    %c0_5 = arith.constant 0 : index
    %c0_6 = arith.constant 0 : index
    %6 = vector.load %arg4[%c0_5, %c0_6] : memref<2x2048xf32, #tpu.memory_space<vmem>>, vector<2x2048xf32>
    tpu.vector_store %arg4[%c0_5, %c0_6], %5 {strides = array<i32>} : memref<2x2048xf32, #tpu.memory_space<vmem>>, vector<2x2048xf32>,
    return
  }
  func.func @transform_0(%arg0: i32) -> (i32, i32) {
    %c0_i32 = arith.constant 0 : i32
    %c0_i32_0 = arith.constant 0 : i32
    %c0_i32_1 = arith.constant 0 : i32
    return %c0_i32, %c0_i32_0 : i32, i32
  }
  func.func @transform_1(%arg0: i32) -> (i32, i32) {
    %c0_i32 = arith.constant 0 : i32
    %c0_i32_0 = arith.constant 0 : i32
    %c0_i32_1 = arith.constant 0 : i32
    return %c0_i32, %c0_i32_0 : i32, i32
  }
  func.func @transform_2(%arg0: i32) -> (i32, i32) {
    %c0_i32 = arith.constant 0 : i32
    %c0_i32_0 = arith.constant 0 : i32
    %c0_i32_1 = arith.constant 0 : i32
    return %c0_i32, %c0_i32_0 : i32, i32
  }
  func.func @transform_3(%arg0: i32) -> (i32, i32) {
    %c0_i32 = arith.constant 0 : i32
    %c0_i32_0 = arith.constant 0 : i32
    %c0_i32_1 = arith.constant 0 : i32
    return %c0_i32, %c0_i32_0 : i32, i32
  }
}

</mosaic_0001>

<bundles_post_ra>
// kernel: tpu_custom_call.1
= control target key start
LH: loop header
LB: loop body
LE: loop exit
PB: predicated region body
PF: predicated region fallthrough
CT: control target
= control target key end

     0   :  { %8 = vsyncpa [#allocation3], 0  ;;  %s1070_s0 = inlined_call_operand.hbm [shape: f32[2,32], index: 0, kind: input, shape index: {}]   ;;  %s1071_s1 = inlined_call_operand.hbm [shape: f32[32,2048], index: 1, kind: input, shape index: {}]   ;;  %s1072_s2 = inlined_call_operand.hbm [shape: f32[1,2048], index: 2, kind: input, shape index: {}]   ;;  %s1073_s3 = inlined_call_operand.hbm [shape: f32[2,2048], index: 3, kind: output, shape index: {}]  }
   0x1   :  { %9 = vsyncpa [#allocation6], 0 }
   0x2   :  { %10 = vsyncpa [#allocation4], 0  ;;  %s983_s12 = smov [#allocation5]  }
   0x3   :  { %s26_s13 = sshll.u32 %s983_s12, 4  ;;  %s27_s13 = int_to_ptr.vmem [resolvable:$true] %s26_s13 }
   0x4   :  { %s905_s14 = scalar_lea.vmem %s27_s13, 8192  ;;  %p910_p1 = scmp.lt.s32.totalorder %s27_s13, %s27_s13 }
   0x5   :  { %p906_p0 = scmp.ne.s32.totalorder %s27_s13, %s905_s14  ;;  %p911_p2 = scmp.lt.s32.totalorder %s905_s14, %s905_s14 }
   0x7   :  { %p912_p3 = por %p911_p2, %p910_p1 }
   0x9   :  { %p913_p4 = pnand %p912_p3, %p906_p0 }
   0xb   :  { %916 = shalt.err (!%p913_p4)
}
   0xc   :  { %s984_s15 = smov 2048   ;;  %s985_s16 = smov 128  }
   0xd   :  { %32 = dma.hbm_to_vmem [thread:$0]  %s1071_s1, 8192, %s27_s13, [#allocation6], %s984_s15, %s984_s15, %s985_s16  }
   0xe   :  { %s986_s19 = smov [#allocation2]   ;;  %s987_s21 = smov [#allocation7]  }
   0xf   :  { %s17_s20 = sshll.u32 %s986_s19, 4  ;;  %s39_s22 = sshll.u32 %s987_s21, 4  ;;  %s18_s20 = int_to_ptr.vmem [resolvable:$true] %s17_s20  ;;  %s40_s22 = int_to_ptr.vmem [resolvable:$true] %s39_s22 }
  0x10   :  { %s925_s23 = scalar_lea.vmem %s18_s20, 32  ;;  %p930_p6 = scmp.lt.s32.totalorder %s18_s20, %s18_s20 }
  0x11   :  { %p926_p5 = scmp.ne.s32.totalorder %s18_s20, %s925_s23  ;;  %p931_p7 = scmp.lt.s32.totalorder %s925_s23, %s925_s23 }
  0x13   :  { %p932_p8 = por %p931_p7, %p930_p6 }
  0x15   :  { %p933_p9 = pnand %p932_p8, %p926_p5 }
  0x17   :  { %936 = shalt.err (!%p933_p9)
}
  0x18   :  { %20 = dma.hbm_to_vmem [thread:$0]  %s1070_s0, 32, %s18_s20, [#allocation3]  }
  0x19   :  { %s945_s26 = scalar_lea.vmem %s40_s22, 256  ;;  %p950_p11 = scmp.lt.s32.totalorder %s40_s22, %s40_s22 }
  0x1a   :  { %p946_p10 = scmp.ne.s32.totalorder %s40_s22, %s945_s26  ;;  %p951_p12 = scmp.lt.s32.totalorder %s945_s26, %s945_s26 }
  0x1c   :  { %p952_p13 = por %p951_p12, %p950_p11 }
  0x1e   :  { %p953_p0 = pnand %p952_p13, %p946_p10 }
  0x20   :  { %956 = shalt.err (!%p953_p0)
}
  0x21   :  { %42 = dma.hbm_to_vmem [thread:$0]  %s1072_s2, 256, %s40_s22, [#allocation6]  }
  0x22   :  { %977 = dma.done.wait [#allocation3], 32  }
  0x23   :  { %978 = vsyncadd [#allocation3], 4294967264 }
  0x24   :  { %979 = dma.done.wait [#allocation6], 8448  }
  0x25   :  { %980 = vsyncadd [#allocation6], 4294958848  ;;  %v988_v0 = vmov 0.0   ;;  %v102_v1 = vld [vmem:[#allocation5 + $0x188] sm:$0xff]  ;;  %v104_v2 = vld [vmem:[#allocation5 + $0x198] sm:$0xff]  ;;  %vm201_vm0 = vcmask 261120  }
  0x26   :  { %269 = vmatprep.mubr.f32.mxu0 %v988_v0  ;;  %340 = vmatprep.mubr.f32.mxu1 %v988_v0  ;;  %v101_v3 = vld [vmem:[#allocation5 + $0x180] sm:$0xff]  ;;  %v103_v4 = vld [vmem:[#allocation5 + $0x190] sm:$0xff]  ;;  %v86_v5 = vld [vmem:[#allocation5 + $0x108] sm:$0xff]  ;;  %s990_s0 = smov [#allocation8]  }
  0x27   :  { %229 = vmatprep.subr.mxu0 %v102_v1  ;;  %300 = vmatprep.subr.mxu1 %v104_v2  ;;  %v88_v6 = vld [vmem:[#allocation5 + $0x118] sm:$0xff]  ;;  %v85_v7 = vld [vmem:[#allocation5 + $0x100] sm:$0xff]  ;;  %v87_v8 = vld [vmem:[#allocation5 + $0x110] sm:$0xff]  ;;  %s871_s2 = sshll.u32 %s990_s0, 4  ;;  %s872_s2 = int_to_ptr.vmem [resolvable:$true] %s871_s2 }
  0x28   :  { %230 = vmatpush1.msra.mxu0 %v101_v3  ;;  %301 = vmatpush1.msra.mxu1 %v103_v4  ;;  %v70_v9 = vld [vmem:[#allocation5 + $0x88] sm:$0xff]  ;;  %v72_v10 = vld [vmem:[#allocation5 + $0x98] sm:$0xff]  ;;  %v69_v11 = vld [vmem:[#allocation5 + $0x80] sm:$0xff]  ;;  %v121_v3 = vlaneseq  ;;  %s957_s28 = scalar_lea.vmem %s872_s2, 512  ;;  %p962_p2 = scmp.lt.s32.totalorder %s872_s2, %s872_s2 }
  0x29   :  { %231 = vmatprep.subr.mxu0 %v86_v5  ;;  %302 = vmatprep.subr.mxu1 %v88_v6  ;;  %v71_v12 = vld [vmem:[#allocation5 + $0x90] sm:$0xff]  ;;  %v54_v13 = vld [vmem:[#allocation5 + $0x8] sm:$0xff]  ;;  %v56_v14 = vld [vmem:[#allocation5 + $0x18] sm:$0xff]  ;;  %p958_p1 = scmp.ne.s32.totalorder %s872_s2, %s957_s28  ;;  %p963_p3 = scmp.lt.s32.totalorder %s957_s28, %s957_s28 }
  0x2a   :  { %232 = vmatpush1.msra.mxu0 %v85_v7  ;;  %303 = vmatpush1.msra.mxu1 %v87_v8  ;;  %v53_v15 = vld [vmem:[#allocation5] sm:$0xff]  ;;  %v55_v16 = vld [vmem:[#allocation5 + $0x10] sm:$0xff]  ;;  %v1022_v17 = vld [vmem:[#allocation2] sm:$0x3]  ;;  %v1046_v4 = vshrl.u32 %v121_v3, 7 }
  0x2b   :  { %233 = vmatprep.subr.mxu0 %v70_v9  ;;  %304 = vmatprep.subr.mxu1 %v72_v10  ;;  %v106_v18 = vld [vmem:[#allocation5 + $0x1a8] sm:$0xff]  ;;  %v108_v19 = vld [vmem:[#allocation5 + $0x1b8] sm:$0xff]  ;;  %v105_v20 = vld [vmem:[#allocation5 + $0x1a0] sm:$0xff]  ;;  %v989_v8 = vmov 1983009808   ;;  %p964_p4 = por %p963_p3, %p962_p2 }
  0x2c   :  { %234 = vmatpush1.msra.mxu0 %v69_v11  ;;  %305 = vmatpush1.msra.mxu1 %v71_v12  ;;  %v107_v21 = vld [vmem:[#allocation5 + $0x1b0] sm:$0xff]  ;;  %v90_v22 = vld [vmem:[#allocation5 + $0x128] sm:$0xff]  ;;  %v92_v23 = vld [vmem:[#allocation5 + $0x138] sm:$0xff]  ;;  %v123_v5 = vsub.s32 0, %v1046_v4  ;;  %v131_v6 = vsub.s32 2, %v1046_v4  ;;  %v792_v9 = vunpack.c.l.s4 %v989_v8  ;;  %v127_v10 = vsub.s32 1, %v1046_v4 }
  0x2d   :  { %235 = vmatprep.subr.mxu0 %v54_v13  ;;  %306 = vmatprep.subr.mxu1 %v56_v14  ;;  %v89_v24 = vld [vmem:[#allocation5 + $0x120] sm:$0xff]  ;;  %v91_v25 = vld [vmem:[#allocation5 + $0x130] sm:$0xff]  ;;  %v74_v26 = vld [vmem:[#allocation5 + $0xa8] sm:$0xff]  ;;  %p965_p5 = pnand %p964_p4, %p958_p1 }
  0x2e   :  { %236 = vmatpush1.msra.mxu0 %v53_v15  ;;  %307 = vmatpush1.msra.mxu1 %v55_v16  ;;  %v76_v27 = vld [vmem:[#allocation5 + $0xb8] sm:$0xff]  ;;  %v73_v28 = vld [vmem:[#allocation5 + $0xa0] sm:$0xff]  ;;  %v75_v29 = vld [vmem:[#allocation5 + $0xb0] sm:$0xff]  ;;  %v793_v13 = vunpack.c.0.s8 %v792_v9 }
  0x2f   :  { %881 = vmatmul.mubr.msk.f32.vlgmr.msra.gmra.mxu0 %vm201_vm0, %v1022_v17  ;;  %882 = vmatmul.mubr.msk.f32.vlgmr.msra.gmra.mxu1 %vm201_vm0, %v1022_v17  ;;  %v58_v30 = vld [vmem:[#allocation5 + $0x28] sm:$0xff]  ;;  %v60_v31 = vld [vmem:[#allocation5 + $0x38] sm:$0xff]  ;;  %v57_v32 = vld [vmem:[#allocation5 + $0x20] sm:$0xff] }
  0x30   :  { %371 = vmatprep.subr.mxu0 %v106_v18  ;;  %442 = vmatprep.subr.mxu1 %v108_v19  ;;  %v59_v33 = vld [vmem:[#allocation5 + $0x30] sm:$0xff]  ;;  %v110_v34 = vld [vmem:[#allocation5 + $0x1c8] sm:$0xff]  ;;  %v112_v35 = vld [vmem:[#allocation5 + $0x1d8] sm:$0xff] }
  0x31   :  { %372 = vmatpush1.msra.mxu0 %v105_v20  ;;  %443 = vmatpush1.msra.mxu1 %v107_v21  ;;  %v109_v36 = vld [vmem:[#allocation5 + $0x1c0] sm:$0xff]  ;;  %v111_v37 = vld [vmem:[#allocation5 + $0x1d0] sm:$0xff]  ;;  %v94_v38 = vld [vmem:[#allocation5 + $0x148] sm:$0xff]  ;;  %v1053_v21 = vsub.s32 %v793_v13, %v1046_v4 }
  0x32   :  { %373 = vmatprep.subr.mxu0 %v90_v22  ;;  %444 = vmatprep.subr.mxu1 %v92_v23  ;;  %v96_v39 = vld [vmem:[#allocation5 + $0x158] sm:$0xff]  ;;  %v93_v40 = vld [vmem:[#allocation5 + $0x140] sm:$0xff]  ;;  %v95_v41 = vld [vmem:[#allocation5 + $0x150] sm:$0xff] }
  0x33   :  { %374 = vmatpush1.msra.mxu0 %v89_v24  ;;  %445 = vmatpush1.msra.mxu1 %v91_v25  ;;  %v78_v42 = vld [vmem:[#allocation5 + $0xc8] sm:$0xff]  ;;  %v80_v43 = vld [vmem:[#allocation5 + $0xd8] sm:$0xff]  ;;  %v77_v44 = vld [vmem:[#allocation5 + $0xc0] sm:$0xff]  ;;  %v139_v25 = vsub.s32 4, %v1046_v4 }
  0x34   :  { %375 = vmatprep.subr.mxu0 %v74_v26  ;;  %446 = vmatprep.subr.mxu1 %v76_v27  ;;  %v79_v45 = vld [vmem:[#allocation5 + $0xd0] sm:$0xff]  ;;  %v62_v46 = vld [vmem:[#allocation5 + $0x48] sm:$0xff]  ;;  %v64_v47 = vld [vmem:[#allocation5 + $0x58] sm:$0xff]  ;;  %v147_v26 = vsub.s32 6, %v1046_v4 }
  0x35   :  { %376 = vmatpush1.msra.mxu0 %v73_v28  ;;  %447 = vmatpush1.msra.mxu1 %v75_v29  ;;  %v61_v48 = vld [vmem:[#allocation5 + $0x40] sm:$0xff]  ;;  %v63_v49 = vld [vmem:[#allocation5 + $0x50] sm:$0xff]  ;;  %v114_v50 = vld [vmem:[#allocation5 + $0x1e8] sm:$0xff]  ;;  %v143_v29 = vsub.s32 5, %v1046_v4 }
  0x36   :  { %377 = vmatprep.subr.mxu0 %v58_v30  ;;  %448 = vmatprep.subr.mxu1 %v60_v31  ;;  %v116_v51 = vld [vmem:[#allocation5 + $0x1f8] sm:$0xff]  ;;  %v113_v52 = vld [vmem:[#allocation5 + $0x1e0] sm:$0xff]  ;;  %v115_v53 = vld [vmem:[#allocation5 + $0x1f0] sm:$0xff]  ;;  %v151_v30 = vsub.s32 7, %v1046_v4 }
  0x37   :  { %378 = vmatpush1.msra.mxu0 %v57_v32  ;;  %411 = vmatprep.mubr.f32.mxu0 %v988_v0  ;;  %v98_v54 = vld [vmem:[#allocation5 + $0x168] sm:$0xff]  ;;  %v100_v55 = vld [vmem:[#allocation5 + $0x178] sm:$0xff]  ;;  %v97_v56 = vld [vmem:[#allocation5 + $0x160] sm:$0xff] }
  0x38   :  { %449 = vmatpush1.msra.mxu1 %v59_v33  ;;  %482 = vmatprep.mubr.f32.mxu1 %v988_v0  ;;  %v99_v57 = vld [vmem:[#allocation5 + $0x170] sm:$0xff]  ;;  %v82_v58 = vld [vmem:[#allocation5 + $0xe8] sm:$0xff]  ;;  %v84_v59 = vld [vmem:[#allocation5 + $0xf8] sm:$0xff] }
  0x39   :  { %883 = vmatmul.mubr.msk.f32.vlgmr.msra.gmra.mxu0 %vm201_vm0, %v1022_v17  ;;  %884 = vmatmul.mubr.msk.f32.vlgmr.msra.gmra.mxu1 %vm201_vm0, %v1022_v17  ;;  %v81_v60 = vld [vmem:[#allocation5 + $0xe0] sm:$0xff]  ;;  %v83_v61 = vld [vmem:[#allocation5 + $0xf0] sm:$0xff]  ;;  %v66_v62 = vld [vmem:[#allocation5 + $0x68] sm:$0xff] }
  0x3a   :  { %513 = vmatprep.subr.mxu0 %v110_v34  ;;  %584 = vmatprep.subr.mxu1 %v112_v35  ;;  %v68_v63 = vld [vmem:[#allocation5 + $0x78] sm:$0xff]  ;;  %v65_v1 = vld [vmem:[#allocation5 + $0x60] sm:$0xff]  ;;  %v67_v2 = vld [vmem:[#allocation5 + $0x70] sm:$0xff] }
  0x3b   :  { %514 = vmatpush1.msra.mxu0 %v109_v36  ;;  %585 = vmatpush1.msra.mxu1 %v111_v37  ;;  %v117_v7 = vld [vmem:[#allocation7] sm:$0xff] }
  0x3c   :  { %515 = vmatprep.subr.mxu0 %v94_v38  ;;  %586 = vmatprep.subr.mxu1 %v96_v39  ;;  %v124_v11 = vrot.slane %v117_v7, %v123_v5  ;;  %v132_v12 = vrot.slane %v117_v7, %v131_v6  ;;  %v128_v14 = vrot.slane %v117_v7, %v127_v10 }
  0x3d   :  { %516 = vmatpush1.msra.mxu0 %v93_v40  ;;  %587 = vmatpush1.msra.mxu1 %v95_v41  ;;  %v140_v33 = vrot.slane %v117_v7, %v139_v25  ;;  %v148_v34 = vrot.slane %v117_v7, %v147_v26  ;;  %v144_v36 = vrot.slane %v117_v7, %v143_v29 }
  0x3e   :  { %517 = vmatprep.subr.mxu0 %v78_v42  ;;  %588 = vmatprep.subr.mxu1 %v80_v43  ;;  %v152_v37 = vrot.slane %v117_v7, %v151_v30 }
  0x3f   :  { %518 = vmatpush1.msra.mxu0 %v77_v44  ;;  %589 = vmatpush1.msra.mxu1 %v79_v45 }
  0x40   :  { %519 = vmatprep.subr.mxu0 %v62_v46  ;;  %590 = vmatprep.subr.mxu1 %v64_v47  ;;  %v118_v46 = vld [vmem:[#allocation7 + $0x8] sm:$0xff] }
  0x41   :  { %520 = vmatpush1.msra.mxu0 %v61_v48  ;;  %553 = vmatprep.mubr.f32.mxu0 %v988_v0  ;;  %v176_v8 = vrot.slane %v118_v46, %v143_v29  ;;  %v184_v9 = vrot.slane %v118_v46, %v151_v30 }
  0x42   :  { %591 = vmatpush1.msra.mxu1 %v63_v49  ;;  %624 = vmatprep.mubr.f32.mxu1 %v988_v0 }
  0x43   :  { %885 = vmatmul.mubr.msk.f32.vlgmr.msra.gmra.mxu0 %vm201_vm0, %v1022_v17  ;;  %886 = vmatmul.mubr.msk.f32.vlgmr.msra.gmra.mxu1 %vm201_vm0, %v1022_v17 }
  0x44   :  { %655 = vmatprep.subr.mxu0 %v114_v50  ;;  %726 = vmatprep.subr.mxu1 %v116_v51  ;;  %v156_v51 = vrot.slane %v118_v46, %v123_v5  ;;  %v172_v5 = vrot.slane %v118_v46, %v139_v25 }
  0x45   :  { %656 = vmatpush1.msra.mxu0 %v113_v52  ;;  %727 = vmatpush1.msra.mxu1 %v115_v53  ;;  %v164_v52 = vrot.slane %v118_v46, %v131_v6 }
  0x46   :  { %657 = vmatprep.subr.mxu0 %v98_v54  ;;  %728 = vmatprep.subr.mxu1 %v100_v55  ;;  %v160_v54 = vrot.slane %v118_v46, %v127_v10 }
  0x47   :  { %658 = vmatpush1.msra.mxu0 %v97_v56  ;;  %729 = vmatpush1.msra.mxu1 %v99_v57 }
  0x48   :  { %659 = vmatprep.subr.mxu0 %v82_v58  ;;  %730 = vmatprep.subr.mxu1 %v84_v59 }
  0x49   :  { %660 = vmatpush1.msra.mxu0 %v81_v60  ;;  %731 = vmatpush1.msra.mxu1 %v83_v61 }
  0x4a   :  { %661 = vmatprep.subr.mxu0 %v66_v62  ;;  %732 = vmatprep.subr.mxu1 %v68_v63 }
  0x4b   :  { %662 = vmatpush1.msra.mxu0 %v65_v1  ;;  %695 = vmatprep.mubr.f32.mxu0 %v988_v0 }
  0x4c   :  { %733 = vmatpush1.msra.mxu1 %v67_v2  ;;  %766 = vmatprep.mubr.f32.mxu1 %v988_v0  ;;  %v135_v0 = vsub.s32 3, %v1046_v4 }
  0x4d   :  { %887 = vmatmul.mubr.msk.f32.vlgmr.msra.gmra.mxu0 %vm201_vm0, %v1022_v17  ;;  %888 = vmatmul.mubr.msk.f32.vlgmr.msra.gmra.mxu1 %vm201_vm0, %v1022_v17 }
  0x4e   :  { %v136_v15 = vrot.slane %v117_v7, %v135_v0  ;;  %v168_v55 = vrot.slane %v118_v46, %v135_v0  ;;  %v180_v7 = vrot.slane %v118_v46, %v147_v26 }
  0xef   :  { %v271_v16 = vpop.f32.mrf.mxu0  ;;  %v342_v17 = vpop.f32.mrf.mxu1 }
  0xf0   :  { %v272_v18 = vadd.f32 %v271_v16, %v124_v11  ;;  %v343_v19 = vadd.f32 %v342_v17, %v132_v12 }
  0xf1   :  { %v273_v20 = vpop.f32.mrf.mxu0  ;;  %v344_v22 = vpop.f32.mrf.mxu1 }
  0xf2   :  { %v274_v23 = vadd.f32 %v273_v20, %v128_v14  ;;  %v345_v24 = vadd.f32 %v344_v22, %v136_v15 }
  0xf4   :  { %v789_v27 = vcombine.low %v272_v18, %v274_v23  ;;  %v790_v28 = vcombine.low %v343_v19, %v345_v24 }
  0xf6   :  { %v797_v31 = vrot.slane %v789_v27, %v1053_v21  ;;  %v804_v32 = vrot.slane %v790_v28, %v1053_v21 }
  0xf8   :  { %v805_v35 = vcombine.low %v797_v31, %v804_v32 }
  0xf9   :  { %v413_v38 = vpop.f32.mrf.mxu0  ;;  %v484_v39 = vpop.f32.mrf.mxu1 }
  0xfa   :  { %861 = vst [vmem:[#allocation8] sm:$0xff] %v805_v35  ;;  %v414_v40 = vadd.f32 %v413_v38, %v140_v33  ;;  %v485_v41 = vadd.f32 %v484_v39, %v148_v34 }
  0xfb   :  { %v415_v42 = vpop.f32.mrf.mxu0  ;;  %v486_v43 = vpop.f32.mrf.mxu1 }
  0xfc   :  { %v416_v44 = vadd.f32 %v415_v42, %v144_v36  ;;  %v487_v45 = vadd.f32 %v486_v43, %v152_v37 }
  0xfe   :  { %v806_v47 = vcombine.low %v414_v40, %v416_v44  ;;  %v807_v48 = vcombine.low %v485_v41, %v487_v45 }
 0x100   :  { %v814_v49 = vrot.slane %v806_v47, %v1053_v21  ;;  %v821_v50 = vrot.slane %v807_v48, %v1053_v21 }
 0x102   :  { %v822_v53 = vcombine.low %v814_v49, %v821_v50 }
 0x103   :  { %v555_v56 = vpop.f32.mrf.mxu0  ;;  %v626_v57 = vpop.f32.mrf.mxu1 }
 0x104   :  { %862 = vst [vmem:[#allocation8 + $0x8] sm:$0xff] %v822_v53  ;;  %v556_v58 = vadd.f32 %v555_v56, %v156_v51  ;;  %v627_v59 = vadd.f32 %v626_v57, %v164_v52 }
 0x105   :  { %v557_v60 = vpop.f32.mrf.mxu0  ;;  %v628_v61 = vpop.f32.mrf.mxu1 }
 0x106   :  { %v558_v62 = vadd.f32 %v557_v60, %v160_v54  ;;  %v629_v63 = vadd.f32 %v628_v61, %v168_v55 }
 0x108   :  { %v823_v1 = vcombine.low %v556_v58, %v558_v62  ;;  %v824_v2 = vcombine.low %v627_v59, %v629_v63 }
 0x10a   :  { %v831_v3 = vrot.slane %v823_v1, %v1053_v21  ;;  %v838_v4 = vrot.slane %v824_v2, %v1053_v21 }
 0x10c   :  { %v839_v6 = vcombine.low %v831_v3, %v838_v4 }
 0x10d   :  { %v697_v10 = vpop.f32.mrf.mxu0  ;;  %v768_v0 = vpop.f32.mrf.mxu1 }
 0x10e   :  { %863 = vst [vmem:[#allocation8 + $0x10] sm:$0xff] %v839_v6  ;;  %v698_v13 = vadd.f32 %v697_v10, %v172_v5  ;;  %v769_v14 = vadd.f32 %v768_v0, %v180_v7 }
 0x10f   :  { %v699_v11 = vpop.f32.mrf.mxu0  ;;  %v770_v12 = vpop.f32.mrf.mxu1 }
 0x110   :  { %v700_v15 = vadd.f32 %v699_v11, %v176_v8  ;;  %v771_v16 = vadd.f32 %v770_v12, %v184_v9 }
 0x112   :  { %v840_v17 = vcombine.low %v698_v13, %v700_v15  ;;  %v841_v18 = vcombine.low %v769_v14, %v771_v16 }
 0x114   :  { %v848_v19 = vrot.slane %v840_v17, %v1053_v21  ;;  %v855_v20 = vrot.slane %v841_v18, %v1053_v21 }
 0x116   :  { %v856_v22 = vcombine.low %v848_v19, %v855_v20 }
 0x118   :  { %864 = vst [vmem:[#allocation8 + $0x18] sm:$0xff] %v856_v22 }
 0x119   :  { %968 = shalt.err (!%p965_p5)
}
 0x11a   :  { %874 = dma.vmem_to_hbm [thread:$0]  %s872_s2, 512, %s1073_s3, [#allocation4]  }
 0x11b   :  { %981 = dma.done.wait [#allocation4], 512  }
 0x11c   :  { %982 = vsyncadd [#allocation4], 4294966784 }
 0x11d   :  { %878 = vsyncpa [#allocation3], 1 }
 0x11e   :  { %879 = vsyncpa [#allocation6], 1 }
 0x11f   :  { %880 = vsyncpa [#allocation4], 1 }

</bundles_post_ra>
